<compile_context>
chip_gen: v5e
topology: v5e:2x2
jax: 0.10.0
libtpu: 0.0.40
codegen_flags: <defaults>
</compile_context>

<pallas_src>
import functools

import jax
import jax.numpy as jnp
import numpy as np
from jax import lax
from jax.experimental import pallas as pl
from jax.experimental.pallas import tpu as pltpu

_LANE = 128
_SUBLANE = 8

# Per-step sample traffic target; keeps double-buffered VMEM footprint
# (~2*2 MiB samples + ~2*2 MiB target + tiny out) under v5e's 16 MiB default.
_STEP_BYTES = 2 * 1024 * 1024
_TR_CAP = 4096  # rows (sublane dim) per r-tile


def _round_up(x, m):
    return ((x + m - 1) // m) * m


def _largest_divisor_leq(n, cap):
    cap = max(1, min(n, cap))
    for d in range(cap, 0, -1):
        if n % d == 0:
            return d
    return 1


def _elbo2_kernel(s_ref, t_ref, o_ref, *scratch, ts, tr, n_samples, n_rows,
                  inv_numel, mask_s, mask_r, use_tcache):
    """Grid step (r, s): accumulate SSE/numel of a (TS, TR, 128) sample slab."""
    r = pl.program_id(0)
    s = pl.program_id(1)
    tcache = scratch[0] if use_tcache else None

    # New R-tile -> zero the resident (8, 128) accumulator; for narrow dtypes
    # also cache the upcast f32 target tile once per R-tile.
    @pl.when(s == 0)
    def _():
        o_ref[...] = jnp.zeros_like(o_ref)
        if use_tcache:
            tcache[...] = t_ref[...].astype(jnp.float32)

    t = tcache[...] if use_tcache else t_ref[...].astype(jnp.float32)
    x = s_ref[...].astype(jnp.float32)
    d = x - t                       # (TS, TR, 128), broadcast over samples
    sq = d * d                      # VPU

    scale = jnp.float32(inv_numel)

    def accumulate(vals):
        # VPU-only partial reduce: vreg-wise adds of (8,128) slabs into the
        # resident output block; TR % 8 == 0 so this reshape is layout-free.
        part = jnp.sum(vals.reshape(-1, _SUBLANE, _LANE), axis=0)
        o_ref[...] += part * scale

    if mask_s or mask_r:
        # Only boundary grid steps pay for the iota/compare/select mask.
        on_boundary = None
        if mask_s:
            on_boundary = s == pl.num_programs(1) - 1
        if mask_r:
            rb = r == pl.num_programs(0) - 1
            on_boundary = rb if on_boundary is None else (on_boundary | rb)

        @pl.when(on_boundary)
        def _():
            mask = None
            if mask_s:
                sid = s * ts + lax.broadcasted_iota(jnp.int32, (ts, tr, _LANE), 0)
                mask = sid < n_samples
            if mask_r:
                rid = r * tr + lax.broadcasted_iota(jnp.int32, (ts, tr, _LANE), 1)
                rmask = rid < n_rows
                mask = rmask if mask is None else (mask & rmask)
            accumulate(jnp.where(mask, sq, 0.0))

        @pl.when(jnp.logical_not(on_boundary))
        def _():
            accumulate(sq)
    else:
        accumulate(sq)


def elbo2_forward(samples, target):
    """samples: (S, *target.shape); target: arbitrary-shaped float array.

    Returns scalar = (1/S) * sum_s mean((samples[s] - target)**2).
    """
    S = int(samples.shape[0])
    assert samples.shape[1:] == target.shape
    n_valid = int(np.prod(target.shape))

    s_flat = samples.reshape(S, n_valid)          # native dtype; cast in-kernel
    t_flat = target.reshape(1, n_valid)

    # Lane-align only: pad columns to the next multiple of 128.  Padded zeros
    # are identical in samples and target -> contribute 0 to the SSE, no mask
    # needed for them.
    n_cols = _round_up(n_valid, _LANE)
    if n_cols != n_valid:
        # TODO(synk): a fully pad-free tail would need a flat/Element-indexed
        # layout; this pad is now only to the next 128-lane boundary.
        s_flat = jnp.pad(s_flat, ((0, 0), (0, n_cols - n_valid)))
        t_flat = jnp.pad(t_flat, ((0, 0), (0, n_cols - n_valid)))
    R = n_cols // _LANE

    s3 = s_flat.reshape(S, R, _LANE)
    t3 = t_flat.reshape(1, R, _LANE)

    itemsize = jnp.dtype(samples.dtype).itemsize

    # --- row tile (sublane dim), always a multiple of 8 ---
    R8 = _round_up(R, _SUBLANE)
    TR = min(R8, _TR_CAP)
    num_r = -(-R // TR)
    # Give v7x's 2 TensorCores a balanced split of the parallel r axis when a
    # single tile would otherwise own everything and tiles stay big (>=1 MiB
    # of sample data per r-tile).
    if num_r == 1 and R8 >= 2048:
        TR = _round_up(-(-R8 // 2), _SUBLANE)
        num_r = -(-R // TR)
    mask_r = (num_r * TR != R)

    # --- sample tile: ~2 MiB of sample bytes per step; prefer TS | S so the
    # sample mask is statically off ---
    per_sample_tile_bytes = TR * _LANE * itemsize
    ts_max = int(max(1, min(S, _STEP_BYTES // per_sample_tile_bytes)))
    ts_div = _largest_divisor_leq(S, ts_max)
    if 2 * ts_div >= ts_max:
        TS, mask_s = ts_div, False
    else:
        TS, mask_s = ts_max, True             # mask gated to last s step only
    num_s = -(-S // TS)

    use_tcache = (jnp.dtype(target.dtype) != jnp.float32) and num_s > 1
    scratch_shapes = [pltpu.VMEM((1, TR, _LANE), jnp.float32)] if use_tcache else []

    kernel = functools.partial(
        _elbo2_kernel, ts=TS, tr=TR, n_samples=S, n_rows=R,
        inv_numel=1.0 / n_valid, mask_s=mask_s, mask_r=mask_r,
        use_tcache=use_tcache)

    partials = pl.pallas_call(
        kernel,
        out_shape=jax.ShapeDtypeStruct((num_r * _SUBLANE, _LANE), jnp.float32),
        grid=(num_r, num_s),
        in_specs=[
            # samples: depends on both axes
            pl.BlockSpec((TS, TR, _LANE), lambda r, s: (s, r, 0)),
            # target: depends only on the outer R-tile axis -> stays resident
            pl.BlockSpec((1, TR, _LANE), lambda r, s: (0, r, 0)),
        ],
        # one (8, 128) partial-sum block per R-tile (parallel outer axis)
        out_specs=pl.BlockSpec((_SUBLANE, _LANE), lambda r, s: (r, 0)),
        scratch_shapes=scratch_shapes,
        compiler_params=pltpu.CompilerParams(
            dimension_semantics=("parallel", "arbitrary")),
    )(s3, t3)

    # Partials already carry the 1/numel factor; one cross-lane reduce and the
    # remaining 1/S scale happen once here.
    return jnp.sum(partials) * jnp.float32(1.0 / S)


def _ref(samples, target):
    per_sample = jnp.mean(
        (samples.astype(jnp.float32) - target[None].astype(jnp.float32)) ** 2,
        axis=tuple(range(1, samples.ndim)))
    return jnp.mean(per_sample)


if __name__ == "__main__":
    # ELBO2 has no learnable parameters; train_size is unused in forward.
    key = jax.random.PRNGKey(0)
    k1, k2, k3, k4 = jax.random.split(key, 4)

    # Case 1: small, nicely divisible shapes (batch=2, channels=4, 16x16).
    S, B, C, H, W = 4, 2, 4, 16, 16
    samples = jax.random.normal(k1, (S, B, C, H, W), dtype=jnp.float32)
    target = jax.random.normal(k2, (B, C, H, W), dtype=jnp.float32)
    result = jax.block_until_ready(elbo2_forward(samples, target))
    ref = _ref(samples, target)
    assert jnp.allclose(result, ref, rtol=1e-5, atol=1e-6), (result, ref)

    # Case 2: ragged shapes (numel not a multiple of 128, R not a multiple of
    # 8) to exercise the gated boundary mask / partial-block path.
    S2 = 5
    samples2 = jax.random.normal(k3, (S2, 3, 7, 50), dtype=jnp.float32)
    target2 = jax.random.normal(k4, (3, 7, 50), dtype=jnp.float32)
    result2 = jax.block_until_ready(elbo2_forward(samples2, target2))
    ref2 = _ref(samples2, target2)
    assert jnp.allclose(result2, ref2, rtol=1e-5, atol=1e-5), (result2, ref2)

    print("KERNEL_OK")
</pallas_src>

<mosaic_0001>
module attributes {stable_mosaic.version = 11 : i64} {
  func.func @_elbo2_kernel(%arg0: i32, %arg1: i32, %arg2: memref<4x16x128xf32, #tpu.memory_space<vmem>>, %arg3: memref<1x16x128xf32, #tpu.memory_space<vmem>>, %arg4: memref<8x128xf32, #tpu.memory_space<vmem>>) attributes {dimension_semantics = [#tpu.dimension_semantics<parallel>, #tpu.dimension_semantics<arbitrary>], iteration_bounds = array<i64: 1, 1>, scalar_prefetch = 0 : i64, scratch_operands = 0 : i64, tpu.core_type = #tpu.core_type<tc>, window_params = [{transform_indices = @transform_0, window_bounds = array<i64: 4, 16, 128>}, {transform_indices = @transform_1, window_bounds = array<i64: 1, 16, 128>}, {transform_indices = @transform_2, window_bounds = array<i64: 8, 128>}]} {
    %c0_i32 = arith.constant 0 : i32
    %0 = arith.cmpi eq, %arg1, %c0_i32 : i32
    %1 = arith.extui %0 : i1 to i32
    %c0_i32_0 = arith.constant 0 : i32
    %2 = arith.cmpi ne, %1, %c0_i32_0 : i32
    scf.if %2 {
      %cst_11 = arith.constant 0.000000e+00 : f32
      %15 = vector.broadcast %cst_11 : f32 to vector<8x128xf32>
      %c0_12 = arith.constant 0 : index
      %c0_13 = arith.constant 0 : index
      %16 = vector.load %arg4[%c0_12, %c0_13] : memref<8x128xf32, #tpu.memory_space<vmem>>, vector<8x128xf32>
      tpu.vector_store %arg4[%c0_12, %c0_13], %15 {strides = array<i32>} : memref<8x128xf32, #tpu.memory_space<vmem>>, vector<8x128xf32>,
    } else {
    }
    %c0 = arith.constant 0 : index
    %c0_1 = arith.constant 0 : index
    %c0_2 = arith.constant 0 : index
    %3 = vector.load %arg3[%c0, %c0_1, %c0_2] : memref<1x16x128xf32, #tpu.memory_space<vmem>>, vector<1x16x128xf32>
    %c0_3 = arith.constant 0 : index
    %c0_4 = arith.constant 0 : index
    %c0_5 = arith.constant 0 : index
    %4 = vector.load %arg2[%c0_3, %c0_4, %c0_5] : memref<4x16x128xf32, #tpu.memory_space<vmem>>, vector<4x16x128xf32>
    %5 = vector.broadcast %3 : vector<1x16x128xf32> to vector<4x16x128xf32>
    %6 = arith.subf %4, %5 : vector<4x16x128xf32>
    %7 = arith.mulf %6, %6 : vector<4x16x128xf32>
    %8 = vector.shape_cast %7 : vector<4x16x128xf32> to vector<8x8x128xf32>
    %cst = arith.constant dense<0.000000e+00> : vector<8x128xf32>
    %9 = vector.multi_reduction <add>, %8, %cst [0] : vector<8x8x128xf32> to vector<8x128xf32>
    %c0_6 = arith.constant 0 : index
    %c0_7 = arith.constant 0 : index
    %10 = vector.load %arg4[%c0_6, %c0_7] : memref<8x128xf32, #tpu.memory_space<vmem>>, vector<8x128xf32>
    %cst_8 = arith.constant 4.8828125E-4 : f32
    %11 = vector.broadcast %cst_8 : f32 to vector<8x128xf32>
    %12 = arith.mulf %9, %11 : vector<8x128xf32>
    %13 = arith.addf %10, %12 : vector<8x128xf32>
    %c0_9 = arith.constant 0 : index
    %c0_10 = arith.constant 0 : index
    %14 = vector.load %arg4[%c0_9, %c0_10] : memref<8x128xf32, #tpu.memory_space<vmem>>, vector<8x128xf32>
    tpu.vector_store %arg4[%c0_9, %c0_10], %13 {strides = array<i32>} : memref<8x128xf32, #tpu.memory_space<vmem>>, vector<8x128xf32>,
    return
  }
  func.func @transform_0(%arg0: i32, %arg1: i32) -> (i32, i32, i32) {
    %c0_i32 = arith.constant 0 : i32
    %c0_i32_0 = arith.constant 0 : i32
    return %arg1, %arg0, %c0_i32 : i32, i32, i32
  }
  func.func @transform_1(%arg0: i32, %arg1: i32) -> (i32, i32, i32) {
    %c0_i32 = arith.constant 0 : i32
    %c0_i32_0 = arith.constant 0 : i32
    %c0_i32_1 = arith.constant 0 : i32
    return %c0_i32, %arg0, %c0_i32_0 : i32, i32, i32
  }
  func.func @transform_2(%arg0: i32, %arg1: i32) -> (i32, i32) {
    %c0_i32 = arith.constant 0 : i32
    %c0_i32_0 = arith.constant 0 : i32
    return %arg0, %c0_i32 : i32, i32
  }
}

</mosaic_0001>

<bundles_post_ra>
// kernel: tpu_custom_call.1
= control target key start
LH: loop header
LB: loop body
LE: loop exit
PB: predicated region body
PF: predicated region fallthrough
CT: control target
= control target key end

     0   :  { %7 = vsyncpa [#allocation3], 0  ;;  %s217_s0 = inlined_call_operand.hbm [shape: f32[4,16,128], index: 0, kind: input, shape index: {}]   ;;  %s218_s1 = inlined_call_operand.hbm [shape: f32[1,16,128], index: 1, kind: input, shape index: {}]   ;;  %s219_s2 = inlined_call_operand.hbm [shape: f32[8,128], index: 2, kind: output, shape index: {}]  }
   0x1   :  { %8 = vsyncpa [#allocation6], 0 }
   0x2   :  { %9 = vsyncpa [#allocation4], 0  ;;  %s14_s11 = sshll.u32 %s217_s0, 4  ;;  %s188_s12 = smov [#allocation2]   ;;  %s15_s11 = int_to_ptr.hbm [resolvable:$true] %s14_s11 }
   0x3   :  { %s16_s13 = sshll.u32 %s188_s12, 4  ;;  %s27_s16 = sshll.u32 %s218_s1, 4  ;;  %s17_s13 = int_to_ptr.vmem [resolvable:$true] %s16_s13  ;;  %s28_s16 = int_to_ptr.hbm [resolvable:$true] %s27_s16 }
   0x4   :  { %s189_s17 = smov 128   ;;  %s190_s18 = smov 8  }
   0x5   :  { %22 = dma.hbm_to_vmem [thread:$0]  %s15_s11, 1024, %s17_s13, [#allocation3], %s189_s17, %s189_s17, %s190_s18  }
   0x6   :  { %s191_s19 = smov [#allocation5]  }
   0x7   :  { %s29_s20 = sshll.u32 %s191_s19, 4  ;;  %s30_s20 = int_to_ptr.vmem [resolvable:$true] %s29_s20 }
   0x8   :  { %35 = dma.hbm_to_vmem [thread:$0]  %s28_s16, 256, %s30_s20, [#allocation6], %s189_s17, %s189_s17, %s190_s18  }
   0x9   :  { %182 = dma.done.wait [#allocation3], 1024  }
   0xa   :  { %183 = vsyncadd [#allocation3], 4294966272 }
   0xb   :  { %184 = dma.done.wait [#allocation6], 256  }
   0xc   :  { %185 = vsyncadd [#allocation6], 4294967040  ;;  %v49_v0 = vld [vmem:[#allocation5] sm:$0xff]  ;;  %v50_v1 = vld [vmem:[#allocation5 + $0x8] sm:$0xff]  ;;  %s192_s0 = smov [#allocation7]   ;;  %s93_s23 = sshll.u32 %s219_s2, 4  ;;  %s94_s23 = int_to_ptr.hbm [resolvable:$true] %s93_s23 }
   0xd   :  { %v51_v2 = vld [vmem:[#allocation2] sm:$0xff]  ;;  %v52_v3 = vld [vmem:[#allocation2 + $0x8] sm:$0xff]  ;;  %v53_v4 = vld [vmem:[#allocation2 + $0x10] sm:$0xff]  ;;  %s91_s1 = sshll.u32 %s192_s0, 4  ;;  %s92_s1 = int_to_ptr.vmem [resolvable:$true] %s91_s1 }
   0xe   :  { %v54_v5 = vld [vmem:[#allocation2 + $0x18] sm:$0xff]  ;;  %v59_v6 = vsub.f32 %v51_v2, %v49_v0  ;;  %v55_v7 = vld [vmem:[#allocation2 + $0x20] sm:$0xff]  ;;  %v60_v8 = vsub.f32 %v52_v3, %v50_v1  ;;  %v61_v9 = vsub.f32 %v53_v4, %v49_v0  ;;  %v56_v11 = vld [vmem:[#allocation2 + $0x28] sm:$0xff] }
   0xf   :  { %v62_v10 = vsub.f32 %v54_v5, %v50_v1  ;;  %v63_v13 = vsub.f32 %v55_v7, %v49_v0  ;;  %v57_v16 = vld [vmem:[#allocation2 + $0x30] sm:$0xff]  ;;  %v64_v17 = vsub.f32 %v56_v11, %v50_v1  ;;  %v58_v20 = vld [vmem:[#allocation2 + $0x38] sm:$0xff] }
  0x10   :  { %v67_v12 = vmul.f32 %v59_v6, %v59_v6  ;;  %v68_v14 = vmul.f32 %v60_v8, %v60_v8  ;;  %v69_v15 = vmul.f32 %v61_v9, %v61_v9  ;;  %v65_v21 = vsub.f32 %v57_v16, %v49_v0 }
  0x11   :  { %v70_v18 = vmul.f32 %v62_v10, %v62_v10  ;;  %v71_v22 = vmul.f32 %v63_v13, %v63_v13  ;;  %v66_v24 = vsub.f32 %v58_v20, %v50_v1  ;;  %v72_v25 = vmul.f32 %v64_v17, %v64_v17 }
  0x12   :  { %v75_v19 = vadd.f32 %v68_v14, %v67_v12  ;;  %v73_v27 = vmul.f32 %v65_v21, %v65_v21 }
  0x13   :  { %v74_v29 = vmul.f32 %v66_v24, %v66_v24 }
  0x14   :  { %v76_v23 = vadd.f32 %v75_v19, %v69_v15 }
  0x16   :  { %v77_v26 = vadd.f32 %v76_v23, %v70_v18 }
  0x18   :  { %v78_v28 = vadd.f32 %v77_v26, %v71_v22 }
  0x1a   :  { %v79_v30 = vadd.f32 %v78_v28, %v72_v25 }
  0x1c   :  { %v80_v31 = vadd.f32 %v79_v30, %v73_v27 }
  0x1e   :  { %v81_v32 = vadd.f32 %v80_v31, %v74_v29 }
  0x20   :  { %v83_v33 = vmul.f32 0.00048828125, %v81_v32 }
  0x22   :  { %85 = vst [vmem:[#allocation7] sm:$0xff] %v83_v33 }
  0x23   :  { %96 = dma.vmem_to_hbm [thread:$0]  %s92_s1, 128, %s94_s23, [#allocation4]  }
  0x24   :  { %186 = dma.done.wait [#allocation4], 128  }
  0x25   :  { %187 = vsyncadd [#allocation4], 4294967168 }
  0x26   :  { %101 = vsyncpa [#allocation3], 1 }
  0x27   :  { %102 = vsyncpa [#allocation6], 1 }
  0x28   :  { %103 = vsyncpa [#allocation4], 1 }

</bundles_post_ra>
